<compile_context>
chip_gen: v7x
topology: tpu7x:2x2x1
jax: 0.10.0
libtpu: 0.0.40
codegen_flags: <defaults>
</compile_context>

<pallas_src>
import jax
import jax.numpy as jnp
from jax.experimental import pallas as pl
from jax.experimental.pallas import tpu as pltpu


def _style_kernel(latent_ref, ws_ref, wsh_ref, bs_ref, bsh_ref,
                  scale_ref, shift_ref):
    """latent: (N, L); ws/wsh: (L, C); bs/bsh: (1, C) -> scale/shift: (N, C) f32."""
    lat = latent_ref[...].astype(jnp.float32)
    ws = ws_ref[...].astype(jnp.float32)
    wsh = wsh_ref[...].astype(jnp.float32)
    # scale = latent @ W_scale + b_scale + 1.0   (the "+1" of ApplyStyle folded in)
    scale_ref[...] = (jnp.dot(lat, ws, preferred_element_type=jnp.float32)
                      + bs_ref[...].astype(jnp.float32) + 1.0)
    shift_ref[...] = (jnp.dot(lat, wsh, preferred_element_type=jnp.float32)
                      + bsh_ref[...].astype(jnp.float32))


def _modulate_kernel(scale_ref, shift_ref, x_ref, o_ref):
    """scale/shift: (1, C, 1) f32; x/o: (1, C, tHW).  out = x*scale + shift."""
    x = x_ref[...].astype(jnp.float32)
    y = x * scale_ref[...] + shift_ref[...]     # broadcast along the lane (HW) dim
    o_ref[...] = y.astype(o_ref.dtype)


def _pick_spatial_tile(hw):
    """Largest lane-dense tile (multiple of 128, <=1024) dividing HW, else HW."""
    if hw % 128 != 0:
        return hw
    for t in (1024, 512, 256, 128):
        if hw % t == 0:
            return t
    return hw


def apply_style(x, latent, weight, bias):
    """JAX/Pallas equivalent of ApplyStyle.forward.

    x:      (N, C, H, W)
    latent: (N, L)
    weight: (2C, L)   -- nn.Linear(latent_size, 2*channels).weight
    bias:   (2C,)     -- nn.Linear(...).bias
    """
    N, C, H, W = x.shape
    L = latent.shape[-1]
    assert weight.shape == (2 * C, L), weight.shape
    assert bias.shape == (2 * C,), bias.shape
    HW = H * W

    # --- 1) style = Linear(latent), split into scale/shift halves ------------
    w_t = weight.T                                # (L, 2C)  (tiny; layout plumbing)
    ws, wsh = w_t[:, :C], w_t[:, C:]              # (L, C) each
    bs = bias[:C].reshape(1, C)
    bsh = bias[C:].reshape(1, C)

    scale, shift = pl.pallas_call(
        _style_kernel,
        out_shape=(jax.ShapeDtypeStruct((N, C), jnp.float32),
                   jax.ShapeDtypeStruct((N, C), jnp.float32)),
        in_specs=[pl.BlockSpec(memory_space=pltpu.MemorySpace.VMEM)] * 5,
        out_specs=(pl.BlockSpec(memory_space=pltpu.MemorySpace.VMEM),
                   pl.BlockSpec(memory_space=pltpu.MemorySpace.VMEM)),
    )(latent, ws, wsh, bs, bsh)

    # Metadata-only reshapes so the modulation kernel sees (N, C, 1) params
    # (C on sublanes -> broadcasts along lanes with zero in-kernel relayout).
    scale3 = scale.reshape(N, C, 1)
    shift3 = shift.reshape(N, C, 1)
    x3 = x.reshape(N, C, HW)

    # --- 2) gridded, double-buffered modulation of x -------------------------
    thw = _pick_spatial_tile(HW)
    grid = (N, HW // thw)

    tile_bytes = C * thw * x.dtype.itemsize
    # in + out, double-buffered, plus headroom for params / f32 temporaries.
    vmem_limit = int(min(100 * 2**20, max(32 * 2**20, 8 * tile_bytes + (2 << 20))))

    out = pl.pallas_call(
        _modulate_kernel,
        out_shape=jax.ShapeDtypeStruct((N, C, HW), x.dtype),
        grid_spec=pltpu.PrefetchScalarGridSpec(
            num_scalar_prefetch=0,
            grid=grid,
            in_specs=[
                pl.BlockSpec((1, C, 1), lambda n, j: (n, 0, 0)),    # scale (per n)
                pl.BlockSpec((1, C, 1), lambda n, j: (n, 0, 0)),    # shift (per n)
                pl.BlockSpec((1, C, thw), lambda n, j: (n, 0, j)),  # x tile
            ],
            out_specs=pl.BlockSpec((1, C, thw), lambda n, j: (n, 0, j)),
        ),
        compiler_params=pltpu.CompilerParams(
            dimension_semantics=("parallel", "parallel"),
            vmem_limit_bytes=vmem_limit,
        ),
    )(scale3, shift3, x3)

    return out.reshape(N, C, H, W)


def _reference(x, latent, weight, bias):
    """Pure-JAX transcription of the PyTorch ApplyStyle.forward."""
    N, C = x.shape[0], x.shape[1]
    style = latent @ weight.T + bias              # (N, 2C)
    style = style.reshape(N, 2, C, 1, 1)
    return x * (style[:, 0] + 1.0) + style[:, 1]


if __name__ == "__main__":
    key = jax.random.PRNGKey(0)
    k1, k2, k3, k4 = jax.random.split(key, 4)

    N, C, H, W = 2, 4, 16, 16
    L = 32  # small latent size for the smoke test (module default is 512)

    x = jax.random.normal(k1, (N, C, H, W), dtype=jnp.float32)
    latent = jax.random.normal(k2, (N, L), dtype=jnp.float32)
    weight = jax.random.normal(k3, (2 * C, L), dtype=jnp.float32) * 0.1
    bias = jax.random.normal(k4, (2 * C,), dtype=jnp.float32) * 0.1

    out = apply_style(x, latent, weight, bias)
    out = jax.block_until_ready(out)

    ref = _reference(x, latent, weight, bias)
    assert out.shape == ref.shape, (out.shape, ref.shape)
    # Loose enough to tolerate MXU-vs-XLA f32 matmul pass differences;
    # any semantic error (missing +1, swapped scale/shift) is O(1).
    err = float(jnp.max(jnp.abs(out - ref)))
    assert jnp.allclose(out, ref, atol=5e-3, rtol=5e-3), f"mismatch vs reference, max|err|={err}"

    print("KERNEL_OK")
</pallas_src>

<mosaic_0001>
module attributes {stable_mosaic.version = 11 : i64} {
  func.func @_style_kernel(%arg0: memref<2x32xf32, #tpu.memory_space<vmem>>, %arg1: memref<32x4xf32, #tpu.memory_space<vmem>>, %arg2: memref<32x4xf32, #tpu.memory_space<vmem>>, %arg3: memref<1x4xf32, #tpu.memory_space<vmem>>, %arg4: memref<1x4xf32, #tpu.memory_space<vmem>>, %arg5: memref<2x4xf32, #tpu.memory_space<vmem>>, %arg6: memref<2x4xf32, #tpu.memory_space<vmem>>) attributes {dimension_semantics = [], scalar_prefetch = 0 : i64, scratch_operands = 0 : i64, tpu.core_type = #tpu.core_type<tc>} {
    %c0 = arith.constant 0 : index
    %c0_0 = arith.constant 0 : index
    %0 = vector.load %arg0[%c0, %c0_0] : memref<2x32xf32, #tpu.memory_space<vmem>>, vector<2x32xf32>
    %c0_1 = arith.constant 0 : index
    %c0_2 = arith.constant 0 : index
    %1 = vector.load %arg1[%c0_1, %c0_2] : memref<32x4xf32, #tpu.memory_space<vmem>>, vector<32x4xf32>
    %c0_3 = arith.constant 0 : index
    %c0_4 = arith.constant 0 : index
    %2 = vector.load %arg2[%c0_3, %c0_4] : memref<32x4xf32, #tpu.memory_space<vmem>>, vector<32x4xf32>
    %cst = arith.constant dense<0.000000e+00> : vector<2x4xf32>
    %3 = tpu.matmul %0, %1, %cst {dimension_numbers = #tpu.dot_dimension_numbers<[1], [0], [0], [1], [0, 0, 1, 1], [], []>} : vector<2x32xf32>, vector<32x4xf32>, vector<2x4xf32> -> vector<2x4xf32>
    %c0_5 = arith.constant 0 : index
    %c0_6 = arith.constant 0 : index
    %4 = vector.load %arg3[%c0_5, %c0_6] : memref<1x4xf32, #tpu.memory_space<vmem>>, vector<1x4xf32>
    %5 = vector.broadcast %4 : vector<1x4xf32> to vector<2x4xf32>
    %6 = arith.addf %3, %5 : vector<2x4xf32>
    %cst_7 = arith.constant 1.000000e+00 : f32
    %7 = vector.broadcast %cst_7 : f32 to vector<2x4xf32>
    %8 = arith.addf %6, %7 : vector<2x4xf32>
    %c0_8 = arith.constant 0 : index
    %c0_9 = arith.constant 0 : index
    %9 = vector.load %arg5[%c0_8, %c0_9] : memref<2x4xf32, #tpu.memory_space<vmem>>, vector<2x4xf32>
    tpu.vector_store %arg5[%c0_8, %c0_9], %8 {strides = array<i32>} : memref<2x4xf32, #tpu.memory_space<vmem>>, vector<2x4xf32>,
    %cst_10 = arith.constant dense<0.000000e+00> : vector<2x4xf32>
    %10 = tpu.matmul %0, %2, %cst_10 {dimension_numbers = #tpu.dot_dimension_numbers<[1], [0], [0], [1], [0, 0, 1, 1], [], []>} : vector<2x32xf32>, vector<32x4xf32>, vector<2x4xf32> -> vector<2x4xf32>
    %c0_11 = arith.constant 0 : index
    %c0_12 = arith.constant 0 : index
    %11 = vector.load %arg4[%c0_11, %c0_12] : memref<1x4xf32, #tpu.memory_space<vmem>>, vector<1x4xf32>
    %12 = vector.broadcast %11 : vector<1x4xf32> to vector<2x4xf32>
    %13 = arith.addf %10, %12 : vector<2x4xf32>
    %c0_13 = arith.constant 0 : index
    %c0_14 = arith.constant 0 : index
    %14 = vector.load %arg6[%c0_13, %c0_14] : memref<2x4xf32, #tpu.memory_space<vmem>>, vector<2x4xf32>
    tpu.vector_store %arg6[%c0_13, %c0_14], %13 {strides = array<i32>} : memref<2x4xf32, #tpu.memory_space<vmem>>, vector<2x4xf32>,
    return
  }
}

</mosaic_0001>

<bundles_post_ra>
// kernel: tpu_custom_call.1
= control target key start
LH: loop header
LB: loop body
LE: loop exit
PB: predicated region body
PF: predicated region fallthrough
CT: control target
= control target key end

     0   :  { %12 = vsyncpa [#allocation3], 0  ;;  %v324_v3 = vmov 0.0|0.0   ;;  %vm325_vm0 = vmmov 0   ;;  %v326_v11 = vmov 0.0   ;;  %s421_s0 = inlined_call_operand.vmem [shape: f32[2,32], index: 0, kind: input, shape index: {}]   ;;  %s422_s1 = inlined_call_operand.vmem [shape: f32[32,4], index: 1, kind: input, shape index: {}]   ;;  %s423_s2 = inlined_call_operand.vmem [shape: f32[32,4], index: 2, kind: input, shape index: {}]   ;;  %s424_s3 = inlined_call_operand.vmem [shape: f32[1,4], index: 3, kind: input, shape index: {}]   ;;  %s425_s4 = inlined_call_operand.vmem [shape: f32[1,4], index: 4, kind: input, shape index: {}]   ;;  %s426_s5 = inlined_call_operand.hbm [shape: f32[2,4], index: 5, kind: output, shape index: {0}]   ;;  %s427_s6 = inlined_call_operand.hbm [shape: f32[2,4], index: 6, kind: output, shape index: {1}]  }
   0x1   :  { %v25_v0 = vld [vmem:[%s422_s1] sm:$0xff]  ;;  %v26_v1 = vld [vmem:[%s422_s1 + $0x8] sm:$0xff]  ;;  %259 = vmatprep.subr.bf16.mxu0 %v324_v3  ;;  %265 = vmatprep.subr.bf16.mxu1 %v324_v3  ;;  %v27_v6 = vld [vmem:[%s422_s1 + $0x10] sm:$0xff] }
   0x2   :  { %v29_v2 = vld [vmem:[%s423_s2] sm:$0xff]  ;;  %v260_v4 = vpack.c.bf16 %v26_v1, %v25_v0  ;;  %v30_v5 = vld [vmem:[%s423_s2 + $0x8] sm:$0xff]  ;;  %v28_v7 = vld [vmem:[%s422_s1 + $0x18] sm:$0xff]  ;;  %245 = vmatprep.mubr.msk.f32.mxu0 %vm325_vm0, %v326_v11  ;;  %256 = vmatprep.mubr.msk.f32.mxu1 %vm325_vm0, %v326_v11 }
   0x3   :  { %v266_v8 = vpack.c.bf16 %v30_v5, %v29_v2  ;;  %v31_v9 = vld [vmem:[%s423_s2 + $0x10] sm:$0xff]  ;;  %v32_v10 = vld [vmem:[%s423_s2 + $0x18] sm:$0xff]  ;;  %v263_v12 = vpack.c.bf16 %v28_v7, %v27_v6 }
   0x4   :  { %261 = vmatpush3.bf16.msra.mxu0 %v260_v4 }
   0x5   :  { %13 = vsyncpa [#allocation5], 0  ;;  %267 = vmatpush3.bf16.msra.mxu1 %v266_v8  ;;  %262 = vmatprep.subr.bf16.mxu0 %v324_v3  ;;  %v269_v13 = vpack.c.bf16 %v32_v10, %v31_v9  ;;  %v24_v14 = vld [vmem:[%s421_s0] sm:$0x3]  ;;  %vm40_vm1 = vcmask 261120   ;;  %s327_s17 = smov [#allocation4]  }
   0x6   :  { %268 = vmatprep.subr.bf16.mxu1 %v324_v3  ;;  %v223_v15 = vld [vmem:[%s424_s3] ss:$0 sm:$0xff]  ;;  %s211_s18 = sshll.u32 %s327_s17, 4  ;;  %s328_s19 = smov [#allocation2]   ;;  %vm115_vm2 = vcmask 25600   ;;  %s212_s18 = int_to_ptr.vmem [resolvable:$true] %s211_s18 }
   0x7   :  { %v225_v16 = vld [vmem:[%s425_s4] ss:$0 sm:$0xff]  ;;  %s201_s20 = sshll.u32 %s328_s19, 4  ;;  %s276_s0 = scalar_lea.vmem %s212_s18, 32  ;;  %s202_s20 = int_to_ptr.vmem [resolvable:$true] %s201_s20 }
   0x8   :  { %264 = vmatpush3.bf16.msra.mxu0 %v263_v12  ;;  %p277_p0 = scmp.ne.s32.totalorder %s212_s18, %s276_s0  ;;  %p281_p1 = scmp.lt.s32.totalorder %s212_s18, %s212_s18 }
   0x9   :  { %270 = vmatpush3.bf16.msra.mxu1 %v269_v13  ;;  %p282_p2 = scmp.lt.s32.totalorder %s276_s0, %s276_s0 }
   0xb   :  { %246 = vmatmul.mubr.msk.f32.vlgmr.msra.gmra.mrb[0].mxu0 %vm40_vm1, %v24_v14  ;;  %p283_p3 = por %p282_p2, %p281_p1 }
   0xc   :  { %257 = vmatmul.mubr.msk.f32.vlgmr.msra.gmra.mrb[0].mxu1 %vm40_vm1, %v24_v14 }
   0xd   :  { %p284_p4 = pnand %p283_p3, %p277_p0 }
  0xde   :  { %v110_v17 = vpop.f32.mrb[0].mxu0 }
  0xdf   :  { %v111_v18 = vadd.f32 %v223_v15, %v110_v17  ;;  %v247_v19 = vpop.f32.mrb[1].mxu0  ;;  %v190_v20 = vpop.f32.mrb[0].mxu1 }
  0xe0   :  { %v191_v21 = vadd.f32 %v225_v16, %v190_v20  ;;  %v258_v22 = vpop.f32.mrb[1].mxu1 }
  0xe1   :  { %v114_v23 = vadd.f32 1.0, %v111_v18 }
  0xe2   :  { %194 = vst.msk [vmem:[#allocation4] sm:$0x3] %vm115_vm2, %v191_v21 }
  0xe3   :  { %116 = vst.msk [vmem:[#allocation2] sm:$0x3] %vm115_vm2, %v114_v23 }
  0xe4   :  { %287 = shalt.err (!%p284_p4)
}
  0xe5   :  { %s288_s21 = scalar_lea.hbm %s427_s6, 32 }
  0xe6   :  { %p289_p5 = scmp.ne.s32.totalorder %s427_s6, %s288_s21  ;;  %p292_p6 = scmp.lt.u32.totalorder %s288_s21, %s427_s6 }
  0xe8   :  { %p294_p7 = pnand %p292_p6, %p289_p5 }
  0xea   :  { %297 = shalt.err (!%p294_p7)
}
  0xeb   :  { %214 = dma.vmem_to_hbm [thread:$0]  %s212_s18, 32, %s427_s6, [#allocation5]  }
  0xec   :  { %s298_s28 = scalar_lea.vmem %s202_s20, 32  ;;  %p303_p9 = scmp.lt.s32.totalorder %s202_s20, %s202_s20 }
  0xed   :  { %p299_p8 = scmp.ne.s32.totalorder %s202_s20, %s298_s28  ;;  %p304_p10 = scmp.lt.s32.totalorder %s298_s28, %s298_s28 }
  0xef   :  { %p305_p11 = por %p304_p10, %p303_p9 }
  0xf1   :  { %p306_p12 = pnand %p305_p11, %p299_p8 }
  0xf3   :  { %309 = shalt.err (!%p306_p12)
}
  0xf4   :  { %s310_s7 = scalar_lea.hbm %s426_s5, 32 }
  0xf5   :  { %p311_p13 = scmp.ne.s32.totalorder %s426_s5, %s310_s7  ;;  %p314_p0 = scmp.lt.u32.totalorder %s310_s7, %s426_s5 }
  0xf7   :  { %p316_p1 = pnand %p314_p0, %p311_p13 }
  0xf9   :  { %319 = shalt.err (!%p316_p1)
}
  0xfa   :  { %204 = dma.vmem_to_hbm [thread:$0]  %s202_s20, 32, %s426_s5, [#allocation3]  }
  0xfb   :  { %320 = dma.done.wait [#allocation3], 32  }
  0xfc   :  { %321 = vsyncadd [#allocation3], 4294967264 }
  0xfd   :  { %322 = dma.done.wait [#allocation5], 32  }
  0xfe   :  { %323 = vsyncadd [#allocation5], 4294967264 }
  0xff   :  { %221 = vsyncpa [#allocation3], 1 }
 0x100   :  { %222 = vsyncpa [#allocation5], 1 }

</bundles_post_ra>
